<compile_context>
chip_gen: v7x
topology: tpu7x:2x2x1
jax: 0.10.0
libtpu: 0.0.40
codegen_flags: <defaults>
</compile_context>

<pallas_src>
import jax
import jax.numpy as jnp
from jax.experimental import pallas as pl
from jax.experimental.pallas import tpu as pltpu


LANE = 128     # TPU lane width: pad every feature dim to this
SUBLANE = 8    # TPU sublane width: pad node / edge counts to multiples of this


def _round_up(x, m):
    return ((x + m - 1) // m) * m


# ----------------------------- Pallas kernel -------------------------------


def _fused_sage_edge_kernel(
    a_ref, x_ref,
    ws0_ref, wn0_ref, b0_ref,
    ws1_ref, wn1_ref, b1_ref,
    ws2_ref, wn2_ref, b2_ref,
    su_ref, sv_ref, wu_ref, wv_ref, bp_ref,
    o_ref,
):
    """Whole forward pass in one kernel; intermediates stay in VMEM/vregs."""
    f32 = jnp.float32
    a = a_ref[...]  # (N_pad, N_pad) row-normalized adjacency, loaded once

    def sage(h, ws, wn, b, relu):
        # DGL SAGEConv(mean): out = H @ W_self + (A @ H) @ W_neigh + b
        # All feature dims are padded to the same 128-lane width, so both
        # matmul orders for the neighbor term cost the same; keep (A @ H) @ Wn.
        # NOTE: operands could be cast to bf16 here for v6e/v7x MXU peak while
        # keeping f32 accumulation; kept f32 to preserve exact reference math.
        neigh = jnp.dot(a, h, preferred_element_type=f32)
        out = (
            jnp.dot(h, ws, preferred_element_type=f32)
            + jnp.dot(neigh, wn, preferred_element_type=f32)
            + b
        )
        if relu:
            out = jnp.maximum(out, 0.0)
        return out

    h = sage(x_ref[...], ws0_ref[...], wn0_ref[...], b0_ref[...], relu=True)
    h = sage(h, ws1_ref[...], wn1_ref[...], b1_ref[...], relu=True)
    h = sage(h, ws2_ref[...], wn2_ref[...], b2_ref[...], relu=False)

    # Edge predictor: score[e] = h[src[e]] @ W_u + h[dst[e]] @ W_v + b.
    # Apply the (F, F) weights to the N_pad node rows FIRST, then gather the
    # edge endpoints with one-hot selection matmuls (all on the MXU, no XLA
    # gather, no HBM round-trip of H).  Selection commutes with the linear
    # map, so this is exact and cheaper whenever E > N.
    hwu = jnp.dot(h, wu_ref[...], preferred_element_type=f32)
    hwv = jnp.dot(h, wv_ref[...], preferred_element_type=f32)
    score = (
        jnp.dot(su_ref[...], hwu, preferred_element_type=f32)
        + jnp.dot(sv_ref[...], hwv, preferred_element_type=f32)
        + bp_ref[...]
    )
    o_ref[...] = score.astype(o_ref.dtype)  # lane-dense (E_pad, 128) store


def _fused_forward_call(a_p, x_p, pp, su_p, sv_p):
    e_pad = su_p.shape[0]
    f_pad = x_p.shape[1]
    args = [
        a_p, x_p,
        pp["w_self_0"], pp["w_neigh_0"], pp["b_0"],
        pp["w_self_1"], pp["w_neigh_1"], pp["b_1"],
        pp["w_self_2"], pp["w_neigh_2"], pp["b_2"],
        su_p, sv_p,
        pp["w_pred_u"], pp["w_pred_v"], pp["b_pred"],
    ]
    in_specs = [pl.BlockSpec(arg.shape, lambda: (0, 0)) for arg in args]
    return pl.pallas_call(
        _fused_sage_edge_kernel,
        out_shape=jax.ShapeDtypeStruct((e_pad, f_pad), jnp.float32),
        in_specs=in_specs,
        out_specs=pl.BlockSpec((e_pad, f_pad), lambda: (0, 0)),
        compiler_params=pltpu.CompilerParams(
            # Explicit, generation-safe budget (well below v7x's 64 MiB VMEM).
            vmem_limit_bytes=32 * 1024 * 1024,
        ),
    )(*args)


# ------------------------------- Model glue --------------------------------


def init_params(key, in_features, hidden_features, out_features):
    dims = [
        (in_features, hidden_features),
        (hidden_features, hidden_features),
        (hidden_features, out_features),
    ]
    params = {}
    keys = jax.random.split(key, 8)
    for i, (fi, fo) in enumerate(dims):
        scale = 1.0 / jnp.sqrt(jnp.float32(fi))
        params[f"w_self_{i}"] = (
            jax.random.uniform(keys[2 * i], (fi, fo), jnp.float32, -1.0, 1.0) * scale
        )
        params[f"w_neigh_{i}"] = (
            jax.random.uniform(keys[2 * i + 1], (fi, fo), jnp.float32, -1.0, 1.0) * scale
        )
        params[f"b_{i}"] = jnp.zeros((1, fo), jnp.float32)
    # Edge predictor: Linear(out_features * 2, out_features) split into Wu / Wv.
    scale = 1.0 / jnp.sqrt(jnp.float32(2 * out_features))
    params["w_pred_u"] = (
        jax.random.uniform(keys[6], (out_features, out_features), jnp.float32, -1.0, 1.0)
        * scale
    )
    params["w_pred_v"] = (
        jax.random.uniform(keys[7], (out_features, out_features), jnp.float32, -1.0, 1.0)
        * scale
    )
    params["b_pred"] = jnp.zeros((1, out_features), jnp.float32)
    return params


def build_norm_adjacency(src, dst, num_nodes):
    """A[v, u] = 1 / in_degree(v) for each edge u -> v (0 rows for isolated dst)."""
    adj = jnp.zeros((num_nodes, num_nodes), jnp.float32).at[dst, src].add(1.0)
    indeg = adj.sum(axis=1, keepdims=True)
    inv = jnp.where(indeg > 0, 1.0 / indeg, 0.0)
    return adj * inv


def _pad2(arr, rows, cols):
    return jnp.pad(arr, ((0, rows - arr.shape[0]), (0, cols - arr.shape[1])))


def model_forward(params, a, src, dst, x):
    n = a.shape[0]
    e = src.shape[0]
    out_features = params["b_pred"].shape[1]

    f_pad = LANE                               # 16 / 32 / 16 -> one 128-wide slab
    n_pad = max(SUBLANE, _round_up(n, SUBLANE))
    e_pad = max(SUBLANE, _round_up(e, SUBLANE))

    # Zero-pad everything to lane/sublane-aligned shapes (zero padding is
    # semantics-preserving: padded feature columns and padded node/edge rows
    # contribute nothing to the real outputs, which we slice out at the end).
    a_p = _pad2(a, n_pad, n_pad)
    x_p = _pad2(x, n_pad, f_pad)

    pp = {}
    for i in range(3):
        pp[f"w_self_{i}"] = _pad2(params[f"w_self_{i}"], f_pad, f_pad)
        pp[f"w_neigh_{i}"] = _pad2(params[f"w_neigh_{i}"], f_pad, f_pad)
        pp[f"b_{i}"] = _pad2(params[f"b_{i}"], 1, f_pad)
    pp["w_pred_u"] = _pad2(params["w_pred_u"], f_pad, f_pad)
    pp["w_pred_v"] = _pad2(params["w_pred_v"], f_pad, f_pad)
    pp["b_pred"] = _pad2(params["b_pred"], 1, f_pad)

    # One-hot edge-endpoint selectors (tiny at these sizes); the actual gather
    # matmuls run inside the fused Pallas kernel.
    su_p = _pad2(jax.nn.one_hot(src, n_pad, dtype=jnp.float32), e_pad, n_pad)
    sv_p = _pad2(jax.nn.one_hot(dst, n_pad, dtype=jnp.float32), e_pad, n_pad)

    scores_p = _fused_forward_call(a_p, x_p, pp, su_p, sv_p)
    return scores_p[:e, :out_features]


# --------------------------------- Driver ----------------------------------

if __name__ == "__main__":
    key = jax.random.PRNGKey(0)
    k_param, k_x, k_src, k_dst = jax.random.split(key, 4)

    num_nodes = 8
    num_edges = 16
    in_features = 16
    hidden_features = 32
    out_features = 16

    params = init_params(k_param, in_features, hidden_features, out_features)

    x = jax.random.normal(k_x, (num_nodes, in_features), jnp.float32)
    src = jax.random.randint(k_src, (num_edges,), 0, num_nodes)
    dst = jax.random.randint(k_dst, (num_edges,), 0, num_nodes)
    a = build_norm_adjacency(src, dst, num_nodes)

    scores = jax.jit(model_forward)(params, a, src, dst, x)
    jax.block_until_ready(scores)

    assert scores.shape == (num_edges, out_features)
    assert scores.dtype == jnp.float32
    print("KERNEL_OK")
</pallas_src>

<mosaic_0001>
module attributes {stable_mosaic.version = 11 : i64} {
  func.func @_fused_sage_edge_kernel(%arg0: memref<8x8xf32, #tpu.memory_space<vmem>>, %arg1: memref<8x128xf32, #tpu.memory_space<vmem>>, %arg2: memref<128x128xf32, #tpu.memory_space<vmem>>, %arg3: memref<128x128xf32, #tpu.memory_space<vmem>>, %arg4: memref<1x128xf32, #tpu.memory_space<vmem>>, %arg5: memref<128x128xf32, #tpu.memory_space<vmem>>, %arg6: memref<128x128xf32, #tpu.memory_space<vmem>>, %arg7: memref<1x128xf32, #tpu.memory_space<vmem>>, %arg8: memref<128x128xf32, #tpu.memory_space<vmem>>, %arg9: memref<128x128xf32, #tpu.memory_space<vmem>>, %arg10: memref<1x128xf32, #tpu.memory_space<vmem>>, %arg11: memref<16x8xf32, #tpu.memory_space<vmem>>, %arg12: memref<16x8xf32, #tpu.memory_space<vmem>>, %arg13: memref<128x128xf32, #tpu.memory_space<vmem>>, %arg14: memref<128x128xf32, #tpu.memory_space<vmem>>, %arg15: memref<1x128xf32, #tpu.memory_space<vmem>>, %arg16: memref<16x128xf32, #tpu.memory_space<vmem>>) attributes {dimension_semantics = [], scalar_prefetch = 0 : i64, scratch_operands = 0 : i64, tpu.core_type = #tpu.core_type<tc>} {
    %c0 = arith.constant 0 : index
    %c0_0 = arith.constant 0 : index
    %0 = vector.load %arg0[%c0, %c0_0] : memref<8x8xf32, #tpu.memory_space<vmem>>, vector<8x8xf32>
    %c0_1 = arith.constant 0 : index
    %c0_2 = arith.constant 0 : index
    %1 = vector.load %arg1[%c0_1, %c0_2] : memref<8x128xf32, #tpu.memory_space<vmem>>, vector<8x128xf32>
    %c0_3 = arith.constant 0 : index
    %c0_4 = arith.constant 0 : index
    %2 = vector.load %arg2[%c0_3, %c0_4] : memref<128x128xf32, #tpu.memory_space<vmem>>, vector<128x128xf32>
    %c0_5 = arith.constant 0 : index
    %c0_6 = arith.constant 0 : index
    %3 = vector.load %arg3[%c0_5, %c0_6] : memref<128x128xf32, #tpu.memory_space<vmem>>, vector<128x128xf32>
    %c0_7 = arith.constant 0 : index
    %c0_8 = arith.constant 0 : index
    %4 = vector.load %arg4[%c0_7, %c0_8] : memref<1x128xf32, #tpu.memory_space<vmem>>, vector<1x128xf32>
    %cst = arith.constant dense<0.000000e+00> : vector<8x128xf32>
    %5 = tpu.matmul %0, %1, %cst {dimension_numbers = #tpu.dot_dimension_numbers<[1], [0], [0], [1], [0, 0, 1, 1], [], []>} : vector<8x8xf32>, vector<8x128xf32>, vector<8x128xf32> -> vector<8x128xf32>
    %cst_9 = arith.constant dense<0.000000e+00> : vector<8x128xf32>
    %6 = tpu.matmul %1, %2, %cst_9 {dimension_numbers = #tpu.dot_dimension_numbers<[1], [0], [0], [1], [0, 0, 1, 1], [], []>} : vector<8x128xf32>, vector<128x128xf32>, vector<8x128xf32> -> vector<8x128xf32>
    %cst_10 = arith.constant dense<0.000000e+00> : vector<8x128xf32>
    %7 = tpu.matmul %5, %3, %cst_10 {dimension_numbers = #tpu.dot_dimension_numbers<[1], [0], [0], [1], [0, 0, 1, 1], [], []>} : vector<8x128xf32>, vector<128x128xf32>, vector<8x128xf32> -> vector<8x128xf32>
    %8 = arith.addf %6, %7 : vector<8x128xf32>
    %9 = vector.broadcast %4 : vector<1x128xf32> to vector<8x128xf32>
    %10 = arith.addf %8, %9 : vector<8x128xf32>
    %cst_11 = arith.constant 0.000000e+00 : f32
    %11 = vector.broadcast %cst_11 : f32 to vector<8x128xf32>
    %12 = arith.maximumf %10, %11 : vector<8x128xf32>
    %c0_12 = arith.constant 0 : index
    %c0_13 = arith.constant 0 : index
    %13 = vector.load %arg5[%c0_12, %c0_13] : memref<128x128xf32, #tpu.memory_space<vmem>>, vector<128x128xf32>
    %c0_14 = arith.constant 0 : index
    %c0_15 = arith.constant 0 : index
    %14 = vector.load %arg6[%c0_14, %c0_15] : memref<128x128xf32, #tpu.memory_space<vmem>>, vector<128x128xf32>
    %c0_16 = arith.constant 0 : index
    %c0_17 = arith.constant 0 : index
    %15 = vector.load %arg7[%c0_16, %c0_17] : memref<1x128xf32, #tpu.memory_space<vmem>>, vector<1x128xf32>
    %cst_18 = arith.constant dense<0.000000e+00> : vector<8x128xf32>
    %16 = tpu.matmul %0, %12, %cst_18 {dimension_numbers = #tpu.dot_dimension_numbers<[1], [0], [0], [1], [0, 0, 1, 1], [], []>} : vector<8x8xf32>, vector<8x128xf32>, vector<8x128xf32> -> vector<8x128xf32>
    %cst_19 = arith.constant dense<0.000000e+00> : vector<8x128xf32>
    %17 = tpu.matmul %12, %13, %cst_19 {dimension_numbers = #tpu.dot_dimension_numbers<[1], [0], [0], [1], [0, 0, 1, 1], [], []>} : vector<8x128xf32>, vector<128x128xf32>, vector<8x128xf32> -> vector<8x128xf32>
    %cst_20 = arith.constant dense<0.000000e+00> : vector<8x128xf32>
    %18 = tpu.matmul %16, %14, %cst_20 {dimension_numbers = #tpu.dot_dimension_numbers<[1], [0], [0], [1], [0, 0, 1, 1], [], []>} : vector<8x128xf32>, vector<128x128xf32>, vector<8x128xf32> -> vector<8x128xf32>
    %19 = arith.addf %17, %18 : vector<8x128xf32>
    %20 = vector.broadcast %15 : vector<1x128xf32> to vector<8x128xf32>
    %21 = arith.addf %19, %20 : vector<8x128xf32>
    %cst_21 = arith.constant 0.000000e+00 : f32
    %22 = vector.broadcast %cst_21 : f32 to vector<8x128xf32>
    %23 = arith.maximumf %21, %22 : vector<8x128xf32>
    %c0_22 = arith.constant 0 : index
    %c0_23 = arith.constant 0 : index
    %24 = vector.load %arg8[%c0_22, %c0_23] : memref<128x128xf32, #tpu.memory_space<vmem>>, vector<128x128xf32>
    %c0_24 = arith.constant 0 : index
    %c0_25 = arith.constant 0 : index
    %25 = vector.load %arg9[%c0_24, %c0_25] : memref<128x128xf32, #tpu.memory_space<vmem>>, vector<128x128xf32>
    %c0_26 = arith.constant 0 : index
    %c0_27 = arith.constant 0 : index
    %26 = vector.load %arg10[%c0_26, %c0_27] : memref<1x128xf32, #tpu.memory_space<vmem>>, vector<1x128xf32>
    %cst_28 = arith.constant dense<0.000000e+00> : vector<8x128xf32>
    %27 = tpu.matmul %0, %23, %cst_28 {dimension_numbers = #tpu.dot_dimension_numbers<[1], [0], [0], [1], [0, 0, 1, 1], [], []>} : vector<8x8xf32>, vector<8x128xf32>, vector<8x128xf32> -> vector<8x128xf32>
    %cst_29 = arith.constant dense<0.000000e+00> : vector<8x128xf32>
    %28 = tpu.matmul %23, %24, %cst_29 {dimension_numbers = #tpu.dot_dimension_numbers<[1], [0], [0], [1], [0, 0, 1, 1], [], []>} : vector<8x128xf32>, vector<128x128xf32>, vector<8x128xf32> -> vector<8x128xf32>
    %cst_30 = arith.constant dense<0.000000e+00> : vector<8x128xf32>
    %29 = tpu.matmul %27, %25, %cst_30 {dimension_numbers = #tpu.dot_dimension_numbers<[1], [0], [0], [1], [0, 0, 1, 1], [], []>} : vector<8x128xf32>, vector<128x128xf32>, vector<8x128xf32> -> vector<8x128xf32>
    %30 = arith.addf %28, %29 : vector<8x128xf32>
    %31 = vector.broadcast %26 : vector<1x128xf32> to vector<8x128xf32>
    %32 = arith.addf %30, %31 : vector<8x128xf32>
    %c0_31 = arith.constant 0 : index
    %c0_32 = arith.constant 0 : index
    %33 = vector.load %arg13[%c0_31, %c0_32] : memref<128x128xf32, #tpu.memory_space<vmem>>, vector<128x128xf32>
    %cst_33 = arith.constant dense<0.000000e+00> : vector<8x128xf32>
    %34 = tpu.matmul %32, %33, %cst_33 {dimension_numbers = #tpu.dot_dimension_numbers<[1], [0], [0], [1], [0, 0, 1, 1], [], []>} : vector<8x128xf32>, vector<128x128xf32>, vector<8x128xf32> -> vector<8x128xf32>
    %c0_34 = arith.constant 0 : index
    %c0_35 = arith.constant 0 : index
    %35 = vector.load %arg14[%c0_34, %c0_35] : memref<128x128xf32, #tpu.memory_space<vmem>>, vector<128x128xf32>
    %cst_36 = arith.constant dense<0.000000e+00> : vector<8x128xf32>
    %36 = tpu.matmul %32, %35, %cst_36 {dimension_numbers = #tpu.dot_dimension_numbers<[1], [0], [0], [1], [0, 0, 1, 1], [], []>} : vector<8x128xf32>, vector<128x128xf32>, vector<8x128xf32> -> vector<8x128xf32>
    %c0_37 = arith.constant 0 : index
    %c0_38 = arith.constant 0 : index
    %37 = vector.load %arg11[%c0_37, %c0_38] : memref<16x8xf32, #tpu.memory_space<vmem>>, vector<16x8xf32>
    %cst_39 = arith.constant dense<0.000000e+00> : vector<16x128xf32>
    %38 = tpu.matmul %37, %34, %cst_39 {dimension_numbers = #tpu.dot_dimension_numbers<[1], [0], [0], [1], [0, 0, 1, 1], [], []>} : vector<16x8xf32>, vector<8x128xf32>, vector<16x128xf32> -> vector<16x128xf32>
    %c0_40 = arith.constant 0 : index
    %c0_41 = arith.constant 0 : index
    %39 = vector.load %arg12[%c0_40, %c0_41] : memref<16x8xf32, #tpu.memory_space<vmem>>, vector<16x8xf32>
    %cst_42 = arith.constant dense<0.000000e+00> : vector<16x128xf32>
    %40 = tpu.matmul %39, %36, %cst_42 {dimension_numbers = #tpu.dot_dimension_numbers<[1], [0], [0], [1], [0, 0, 1, 1], [], []>} : vector<16x8xf32>, vector<8x128xf32>, vector<16x128xf32> -> vector<16x128xf32>
    %41 = arith.addf %38, %40 : vector<16x128xf32>
    %c0_43 = arith.constant 0 : index
    %c0_44 = arith.constant 0 : index
    %42 = vector.load %arg15[%c0_43, %c0_44] : memref<1x128xf32, #tpu.memory_space<vmem>>, vector<1x128xf32>
    %43 = vector.broadcast %42 : vector<1x128xf32> to vector<16x128xf32>
    %44 = arith.addf %41, %43 : vector<16x128xf32>
    %c0_45 = arith.constant 0 : index
    %c0_46 = arith.constant 0 : index
    %45 = vector.load %arg16[%c0_45, %c0_46] : memref<16x128xf32, #tpu.memory_space<vmem>>, vector<16x128xf32>
    tpu.vector_store %arg16[%c0_45, %c0_46], %44 {strides = array<i32>} : memref<16x128xf32, #tpu.memory_space<vmem>>, vector<16x128xf32>,
    return
  }
}

</mosaic_0001>

<bundles_post_ra>
// kernel: model_forward.1
= control target key start
LH: loop header
LB: loop body
LE: loop exit
PB: predicated region body
PF: predicated region fallthrough
CT: control target
= control target key end

     0   :  { %s2487_s0 = inlined_call_operand.vmem [shape: f32[8,8], index: 0, kind: input, shape index: {}]   ;;  %s2488_s1 = inlined_call_operand.vmem [shape: f32[8,128], index: 1, kind: input, shape index: {}]   ;;  %s2489_s2 = inlined_call_operand.vmem [shape: f32[128,128], index: 2, kind: input, shape index: {}]   ;;  %s2490_s3 = inlined_call_operand.vmem [shape: f32[128,128], index: 3, kind: input, shape index: {}]   ;;  %s2491_s4 = inlined_call_operand.vmem [shape: f32[1,128], index: 4, kind: input, shape index: {}]   ;;  %s2492_s5 = inlined_call_operand.vmem [shape: f32[128,128], index: 5, kind: input, shape index: {}]   ;;  %s2493_s6 = inlined_call_operand.vmem [shape: f32[128,128], index: 6, kind: input, shape index: {}]   ;;  %s2494_s7 = inlined_call_operand.vmem [shape: f32[1,128], index: 7, kind: input, shape index: {}]   ;;  %s2495_s8 = inlined_call_operand.vmem [shape: f32[128,128], index: 8, kind: input, shape index: {}]   ;;  %s2496_s9 = inlined_call_operand.vmem [shape: f32[128,128], index: 9, kind: input, shape index: {}]   ;;  %s2497_s10 = inlined_call_operand.vmem [shape: f32[1,128], index: 10, kind: input, shape index: {}]   ;;  %s2498_s11 = inlined_call_operand.vmem [shape: f32[16,8], index: 11, kind: input, shape index: {}]   ;;  %s2499_s12 = inlined_call_operand.vmem [shape: f32[16,8], index: 12, kind: input, shape index: {}]   ;;  %s2500_s13 = inlined_call_operand.vmem [shape: f32[128,128], index: 13, kind: input, shape index: {}]   ;;  %s2501_s14 = inlined_call_operand.vmem [shape: f32[128,128], index: 14, kind: input, shape index: {}]   ;;  %s2502_s15 = inlined_call_operand.vmem [shape: f32[1,128], index: 15, kind: input, shape index: {}]   ;;  %s2503_s16 = inlined_call_operand.hbm [shape: f32[16,128], index: 16, kind: output, shape index: {}]  }
   0x1   :  { %2504 = sst [smem:[#allocation5_spill]] %s2487_s0 }
   0x2   :  { %v1959_v0 = vld [vmem:[%s2488_s1] sm:$0xff]  ;;  %s2505_s25 = sld [smem:[#allocation5_spill]]  ;;  %vm89_vm0 = vcmask 64512   ;;  %v1865_v2 = vmov 0.0   ;;  %vm1866_vm1 = vmmov 0   ;;  %v57_v4 = vld [vmem:[%s2489_s2 + $0x8] sm:$0xff] }
   0x3   :  { %1336 = vmatprep.subr.mxu0 %v1865_v2  ;;  %1338 = vmatprep.mubr.msk.f32.mxu0 %vm1866_vm1, %v1865_v2  ;;  %v56_v3 = vld [vmem:[%s2489_s2] sm:$0xff]  ;;  %v1867_v6 = vmov 0.0|0.0   ;;  %v73_v8 = vld [vmem:[%s2490_s3 + $0x8] sm:$0xff]  ;;  %v58_v9 = vld [vmem:[%s2489_s2 + $0x10] sm:$0xff] }
   0x4   :  { %v72_v5 = vld [vmem:[%s2490_s3] sm:$0xff]  ;;  %1337 = vmatpush3.msra.mxu0 %v1959_v0  ;;  %1641 = vmatprep.subr.bf16.mxu1 %v1867_v6  ;;  %v1666_v7 = vpack.c.bf16 %v57_v4, %v56_v3  ;;  %v59_v10 = vld [vmem:[%s2489_s2 + $0x18] sm:$0xff]  ;;  %v74_v12 = vld [vmem:[%s2490_s3 + $0x10] sm:$0xff] }
   0x5   :  { %1665 = vmatprep.subr.bf16.mxu0 %v1867_v6  ;;  %v1642_v11 = vpack.c.bf16 %v73_v8, %v72_v5  ;;  %v75_v13 = vld [vmem:[%s2490_s3 + $0x18] sm:$0xff]  ;;  %v1669_v14 = vpack.c.bf16 %v59_v10, %v58_v9  ;;  %v60_v16 = vld [vmem:[%s2489_s2 + $0x20] sm:$0xff]  ;;  %v61_v17 = vld [vmem:[%s2489_s2 + $0x28] sm:$0xff]  ;;  %1373 = vmatprep.mubr.msk.f32.mxu1 %vm1866_vm1, %v1865_v2 }
   0x6   :  { %v1645_v15 = vpack.c.bf16 %v75_v13, %v74_v12  ;;  %v76_v18 = vld [vmem:[%s2490_s3 + $0x20] sm:$0xff]  ;;  %v77_v19 = vld [vmem:[%s2490_s3 + $0x28] sm:$0xff]  ;;  %v1672_v20 = vpack.c.bf16 %v61_v17, %v60_v16  ;;  %v62_v22 = vld [vmem:[%s2489_s2 + $0x30] sm:$0xff] }
   0x7   :  { %1643 = vmatpush3.bf16.msra.mxu1 %v1642_v11  ;;  %v1648_v21 = vpack.c.bf16 %v77_v19, %v76_v18  ;;  %v63_v23 = vld [vmem:[%s2489_s2 + $0x38] sm:$0xff]  ;;  %v78_v24 = vld [vmem:[%s2490_s3 + $0x30] sm:$0xff] }
   0x8   :  { %v1964_v1 = vld [vmem:[%s2505_s25] sm:$0xff]  ;;  %1644 = vmatprep.subr.bf16.mxu1 %v1867_v6  ;;  %v79_v25 = vld [vmem:[%s2490_s3 + $0x38] sm:$0xff] }
   0x9   :  { %1339 = vmatmul.mubr.msk.f32.vlgmr.msra.gmra.mrb[0].mxu0 %vm89_vm0, %v1964_v1 }
   0xa   :  { %1667 = vmatpush3.bf16.msra.mxu0 %v1666_v7  ;;  %1408 = vmatprep.mubr.msk.f32.mxu0 %vm1866_vm1, %v1865_v2 }
   0xb   :  { %1668 = vmatprep.subr.bf16.mxu0 %v1867_v6  ;;  %1646 = vmatpush3.bf16.msra.mxu1 %v1645_v15 }
   0xc   :  { %1647 = vmatprep.subr.bf16.mxu1 %v1867_v6 }
   0xe   :  { %1670 = vmatpush3.bf16.msra.mxu0 %v1669_v14 }
   0xf   :  { %1671 = vmatprep.subr.bf16.mxu0 %v1867_v6 }
  0x10   :  { %21 = vsyncpa [#allocation3], 0  ;;  %v1675_v26 = vpack.c.bf16 %v63_v23, %v62_v22  ;;  %1649 = vmatpush3.bf16.msra.mxu1 %v1648_v21  ;;  %v1651_v27 = vpack.c.bf16 %v79_v25, %v78_v24  ;;  %v64_v28 = vld [vmem:[%s2489_s2 + $0x40] sm:$0xff]  ;;  %v65_v29 = vld [vmem:[%s2489_s2 + $0x48] sm:$0xff]  ;;  %s1868_s30 = smov [#allocation2]  }
  0x11   :  { %1650 = vmatprep.subr.bf16.mxu1 %v1867_v6  ;;  %v80_v30 = vld [vmem:[%s2490_s3 + $0x40] sm:$0xff]  ;;  %v81_v31 = vld [vmem:[%s2490_s3 + $0x48] sm:$0xff]  ;;  %v1678_v32 = vpack.c.bf16 %v65_v29, %v64_v28  ;;  %v66_v34 = vld [vmem:[%s2489_s2 + $0x50] sm:$0xff]  ;;  %s1166_s0 = sshll.u32 %s1868_s30, 4  ;;  %s1167_s0 = int_to_ptr.vmem [resolvable:$true] %s1166_s0 }
  0x12   :  { %1673 = vmatpush3.bf16.msra.mxu0 %v1672_v20  ;;  %v1654_v33 = vpack.c.bf16 %v81_v31, %v80_v30  ;;  %v67_v35 = vld [vmem:[%s2489_s2 + $0x58] sm:$0xff]  ;;  %v82_v36 = vld [vmem:[%s2490_s3 + $0x50] sm:$0xff]  ;;  %v68_v40 = vld [vmem:[%s2489_s2 + $0x60] sm:$0xff]  ;;  %s1841_s17 = scalar_lea.vmem %s1167_s0, 256  ;;  %p1846_p1 = scmp.lt.s32.totalorder %s1167_s0, %s1167_s0 }
  0x13   :  { %1674 = vmatprep.subr.bf16.mxu0 %v1867_v6  ;;  %v83_v37 = vld [vmem:[%s2490_s3 + $0x58] sm:$0xff]  ;;  %v1681_v38 = vpack.c.bf16 %v67_v35, %v66_v34  ;;  %v69_v41 = vld [vmem:[%s2489_s2 + $0x68] sm:$0xff]  ;;  %v84_v42 = vld [vmem:[%s2490_s3 + $0x60] sm:$0xff]  ;;  %p1842_p0 = scmp.ne.s32.totalorder %s1167_s0, %s1841_s17  ;;  %p1847_p2 = scmp.lt.s32.totalorder %s1841_s17, %s1841_s17 }
  0x14   :  { %1652 = vmatpush3.bf16.msra.mxu1 %v1651_v27  ;;  %v1657_v39 = vpack.c.bf16 %v83_v37, %v82_v36  ;;  %v85_v43 = vld [vmem:[%s2490_s3 + $0x68] sm:$0xff]  ;;  %v1684_v44 = vpack.c.bf16 %v69_v41, %v68_v40  ;;  %v70_v46 = vld [vmem:[%s2489_s2 + $0x70] sm:$0xff]  ;;  %v71_v47 = vld [vmem:[%s2489_s2 + $0x78] sm:$0xff] }
  0x15   :  { %1653 = vmatprep.subr.bf16.mxu1 %v1867_v6  ;;  %v1660_v45 = vpack.c.bf16 %v85_v43, %v84_v42  ;;  %v86_v48 = vld [vmem:[%s2490_s3 + $0x70] sm:$0xff]  ;;  %v87_v49 = vld [vmem:[%s2490_s3 + $0x78] sm:$0xff]  ;;  %v1687_v50 = vpack.c.bf16 %v71_v47, %v70_v46  ;;  %v311_v52 = vld [vmem:[%s2492_s5] sm:$0xff]  ;;  %p1848_p3 = por %p1847_p2, %p1846_p1 }
  0x16   :  { %1676 = vmatpush3.bf16.msra.mxu0 %v1675_v26  ;;  %v1663_v51 = vpack.c.bf16 %v87_v49, %v86_v48  ;;  %v312_v53 = vld [vmem:[%s2492_s5 + $0x8] sm:$0xff]  ;;  %v313_v55 = vld [vmem:[%s2492_s5 + $0x10] sm:$0xff]  ;;  %v314_v56 = vld [vmem:[%s2492_s5 + $0x18] sm:$0xff] }
  0x17   :  { %1677 = vmatprep.subr.bf16.mxu0 %v1867_v6  ;;  %v1714_v54 = vpack.c.bf16 %v312_v53, %v311_v52  ;;  %v1717_v59 = vpack.c.bf16 %v314_v56, %v313_v55  ;;  %v315_v60 = vld [vmem:[%s2492_s5 + $0x20] sm:$0xff]  ;;  %v316_v61 = vld [vmem:[%s2492_s5 + $0x28] sm:$0xff]  ;;  %v317_v63 = vld [vmem:[%s2492_s5 + $0x30] sm:$0xff]  ;;  %p1849_p4 = pnand %p1848_p3, %p1842_p0 }
  0x18   :  { %1655 = vmatpush3.bf16.msra.mxu1 %v1654_v33  ;;  %v1720_v62 = vpack.c.bf16 %v316_v61, %v315_v60  ;;  %v319_v4 = vld [vmem:[%s2492_s5 + $0x40] sm:$0xff]  ;;  %v320_v5 = vld [vmem:[%s2492_s5 + $0x48] sm:$0xff]  ;;  %v321_v8 = vld [vmem:[%s2492_s5 + $0x50] sm:$0xff] }
  0x19   :  { %1656 = vmatprep.subr.bf16.mxu1 %v1867_v6  ;;  %v1726_v7 = vpack.c.bf16 %v320_v5, %v319_v4  ;;  %v322_v9 = vld [vmem:[%s2492_s5 + $0x58] sm:$0xff]  ;;  %v323_v13 = vld [vmem:[%s2492_s5 + $0x60] sm:$0xff]  ;;  %v324_v14 = vld [vmem:[%s2492_s5 + $0x68] sm:$0xff] }
  0x1a   :  { %1679 = vmatpush3.bf16.msra.mxu0 %v1678_v32  ;;  %v1729_v10 = vpack.c.bf16 %v322_v9, %v321_v8  ;;  %v1732_v15 = vpack.c.bf16 %v324_v14, %v323_v13  ;;  %v325_v16 = vld [vmem:[%s2492_s5 + $0x70] sm:$0xff]  ;;  %v326_v17 = vld [vmem:[%s2492_s5 + $0x78] sm:$0xff]  ;;  %v1178_v19 = vld [vmem:[%s2491_s4] ss:$0 sm:$0xff] }
  0x1b   :  { %1680 = vmatprep.subr.bf16.mxu0 %v1867_v6  ;;  %v1735_v18 = vpack.c.bf16 %v326_v17, %v325_v16  ;;  %v327_v23 = vld [vmem:[%s2493_s6] sm:$0xff]  ;;  %v328_v24 = vld [vmem:[%s2493_s6 + $0x8] sm:$0xff]  ;;  %v329_v28 = vld [vmem:[%s2493_s6 + $0x10] sm:$0xff] }
  0x1c   :  { %1658 = vmatpush3.bf16.msra.mxu1 %v1657_v39  ;;  %v1690_v27 = vpack.c.bf16 %v328_v24, %v327_v23  ;;  %v330_v29 = vld [vmem:[%s2493_s6 + $0x18] sm:$0xff]  ;;  %v331_v31 = vld [vmem:[%s2493_s6 + $0x20] sm:$0xff]  ;;  %v332_v32 = vld [vmem:[%s2493_s6 + $0x28] sm:$0xff] }
  0x1d   :  { %1659 = vmatprep.subr.bf16.mxu1 %v1867_v6  ;;  %v1693_v30 = vpack.c.bf16 %v330_v29, %v329_v28  ;;  %v1696_v33 = vpack.c.bf16 %v332_v32, %v331_v31  ;;  %v333_v34 = vld [vmem:[%s2493_s6 + $0x30] sm:$0xff]  ;;  %v334_v35 = vld [vmem:[%s2493_s6 + $0x38] sm:$0xff]  ;;  %v335_v37 = vld [vmem:[%s2493_s6 + $0x40] sm:$0xff] }
  0x1e   :  { %1682 = vmatpush3.bf16.msra.mxu0 %v1681_v38  ;;  %v1699_v36 = vpack.c.bf16 %v334_v35, %v333_v34  ;;  %v336_v38 = vld [vmem:[%s2493_s6 + $0x48] sm:$0xff]  ;;  %v337_v40 = vld [vmem:[%s2493_s6 + $0x50] sm:$0xff]  ;;  %v338_v41 = vld [vmem:[%s2493_s6 + $0x58] sm:$0xff] }
  0x1f   :  { %1683 = vmatprep.subr.bf16.mxu0 %v1867_v6  ;;  %v1702_v39 = vpack.c.bf16 %v336_v38, %v335_v37  ;;  %v1705_v42 = vpack.c.bf16 %v338_v41, %v337_v40  ;;  %v339_v43 = vld [vmem:[%s2493_s6 + $0x60] sm:$0xff]  ;;  %v341_v46 = vld [vmem:[%s2493_s6 + $0x70] sm:$0xff]  ;;  %v342_v47 = vld [vmem:[%s2493_s6 + $0x78] sm:$0xff] }
  0x20   :  { %1661 = vmatpush3.bf16.msra.mxu1 %v1660_v45  ;;  %v1711_v48 = vpack.c.bf16 %v342_v47, %v341_v46  ;;  %v578_v53 = vld [vmem:[%s2496_s9] sm:$0xff]  ;;  %v580_v55 = vld [vmem:[%s2496_s9 + $0x10] sm:$0xff]  ;;  %v583_v60 = vld [vmem:[%s2496_s9 + $0x28] sm:$0xff] }
  0x21   :  { %1662 = vmatprep.subr.bf16.mxu1 %v1867_v6  ;;  %v587_v4 = vld [vmem:[%s2496_s9 + $0x48] sm:$0xff]  ;;  %v589_v8 = vld [vmem:[%s2496_s9 + $0x58] sm:$0xff]  ;;  %v592_v13 = vld [vmem:[%s2496_s9 + $0x70] sm:$0xff] }
  0x22   :  { %1685 = vmatpush3.bf16.msra.mxu0 %v1684_v44  ;;  %v340_v44 = vld [vmem:[%s2493_s6 + $0x68] sm:$0xff]  ;;  %v593_v14 = vld [vmem:[%s2496_s9 + $0x78] sm:$0xff]  ;;  %v1180_v16 = vld [vmem:[%s2494_s7] ss:$0 sm:$0xff] }
  0x23   :  { %1686 = vmatprep.subr.bf16.mxu0 %v1867_v6  ;;  %v1708_v45 = vpack.c.bf16 %v340_v44, %v339_v43  ;;  %v566_v28 = vld [vmem:[%s2495_s8 + $0x20] sm:$0xff]  ;;  %v567_v29 = vld [vmem:[%s2495_s8 + $0x28] sm:$0xff]  ;;  %v569_v31 = vld [vmem:[%s2495_s8 + $0x38] sm:$0xff] }
  0x24   :  { %1664 = vmatpush3.bf16.msra.mxu1 %v1663_v51  ;;  %v571_v34 = vld [vmem:[%s2495_s8 + $0x48] sm:$0xff]  ;;  %v573_v37 = vld [vmem:[%s2495_s8 + $0x58] sm:$0xff] }
  0x25   :  { %1713 = vmatprep.subr.bf16.mxu1 %v1867_v6  ;;  %v575_v40 = vld [vmem:[%s2495_s8 + $0x68] sm:$0xff]  ;;  %v577_v43 = vld [vmem:[%s2495_s8 + $0x78] sm:$0xff] }
  0x26   :  { %1688 = vmatpush3.bf16.msra.mxu0 %v1687_v50  ;;  %v899_v46 = vld [vmem:[%s2501_s14 + $0x8] sm:$0xff] }
  0x27   :  { %1411 = vmatprep.subr.mxu0 %v1865_v2 }
  0x29   :  { %1409 = vmatmul.mubr.f32.vlgmr.msra.gmra.mrb[2].mxu0 %v1959_v0  ;;  %v318_v0 = vld [vmem:[%s2492_s5 + $0x38] sm:$0xff] }
  0x2a   :  { %1413 = vmatprep.mubr.msk.f32.mxu0 %vm1866_vm1, %v1865_v2  ;;  %v1723_v3 = vpack.c.bf16 %v318_v0, %v317_v63  ;;  %v585_v63 = vld [vmem:[%s2496_s9 + $0x38] sm:$0xff] }
  0xdc   :  { %v159_v57 = vpop.f32.mrb[0].mxu0 }
  0xdd   :  { %v1340_v58 = vpop.f32.mrb[1].mxu0  ;;  %1374 = vmatmul.mubr.f32.vlgmr.msra.gmra.mrb[0].mxu1 %v159_v57  ;;  %v581_v57 = vld [vmem:[%s2496_s9 + $0x18] sm:$0xff] }
  0xde   :  { %1715 = vmatpush3.bf16.msra.mxu1 %v1714_v54  ;;  %1483 = vmatprep.mubr.msk.f32.mxu1 %vm1866_vm1, %v1865_v2  ;;  %v579_v54 = vld [vmem:[%s2496_s9 + $0x8] sm:$0xff]  ;;  %v1741_v58 = vpack.c.bf16 %v581_v57, %v580_v55  ;;  %v905_v55 = vld [vmem:[%s2501_s14 + $0x38] sm:$0xff]  ;;  %v906_v57 = vld [vmem:[%s2501_s14 + $0x40] sm:$0xff] }
  0xdf   :  { %1716 = vmatprep.subr.bf16.mxu1 %v1867_v6  ;;  %v1738_v56 = vpack.c.bf16 %v579_v54, %v578_v53  ;;  %v904_v54 = vld [vmem:[%s2501_s14 + $0x30] sm:$0xff] }
  0xe2   :  { %1718 = vmatpush3.bf16.msra.mxu1 %v1717_v59  ;;  %v582_v59 = vld [vmem:[%s2496_s9 + $0x20] sm:$0xff] }
  0xe3   :  { %1719 = vmatprep.subr.bf16.mxu1 %v1867_v6  ;;  %v1744_v61 = vpack.c.bf16 %v583_v60, %v582_v59  ;;  %v908_v60 = vld [vmem:[%s2501_s14 + $0x50] sm:$0xff] }
  0xe6   :  { %1721 = vmatpush3.bf16.msra.mxu1 %v1720_v62  ;;  %v584_v62 = vld [vmem:[%s2496_s9 + $0x30] sm:$0xff] }
  0xe7   :  { %1722 = vmatprep.subr.bf16.mxu1 %v1867_v6  ;;  %v1747_v0 = vpack.c.bf16 %v585_v63, %v584_v62  ;;  %v910_v63 = vld [vmem:[%s2501_s14 + $0x60] sm:$0xff] }
  0xea   :  { %1724 = vmatpush3.bf16.msra.mxu1 %v1723_v3  ;;  %v586_v3 = vld [vmem:[%s2496_s9 + $0x40] sm:$0xff] }
  0xeb   :  { %1725 = vmatprep.subr.bf16.mxu1 %v1867_v6  ;;  %v1750_v5 = vpack.c.bf16 %v587_v4, %v586_v3  ;;  %v812_v4 = vld [vmem:[%s2500_s13] sm:$0xff] }
  0xee   :  { %1727 = vmatpush3.bf16.msra.mxu1 %v1726_v7  ;;  %v588_v7 = vld [vmem:[%s2496_s9 + $0x50] sm:$0xff] }
  0xef   :  { %1728 = vmatprep.subr.bf16.mxu1 %v1867_v6  ;;  %v1753_v9 = vpack.c.bf16 %v589_v8, %v588_v7  ;;  %v814_v8 = vld [vmem:[%s2500_s13 + $0x10] sm:$0xff] }
  0xf2   :  { %1730 = vmatpush3.bf16.msra.mxu1 %v1729_v10  ;;  %v590_v10 = vld [vmem:[%s2496_s9 + $0x60] sm:$0xff] }
  0xf3   :  { %1731 = vmatprep.subr.bf16.mxu1 %v1867_v6 }
  0xf6   :  { %1733 = vmatpush3.bf16.msra.mxu1 %v1732_v15  ;;  %v1759_v15 = vpack.c.bf16 %v593_v14, %v592_v13  ;;  %v816_v13 = vld [vmem:[%s2500_s13 + $0x20] sm:$0xff]  ;;  %v817_v14 = vld [vmem:[%s2500_s13 + $0x28] sm:$0xff] }
  0xf7   :  { %1734 = vmatprep.subr.bf16.mxu1 %v1867_v6 }
  0xfa   :  { %1736 = vmatpush3.bf16.msra.mxu1 %v1735_v18 }
  0xfb   :  { %1737 = vmatprep.subr.bf16.mxu1 %v1867_v6 }
  0xfc   :  { %v299_v11 = vpop.f32.mrb[2].mxu0 }
  0xfd   :  { %v1410_v12 = vpop.f32.mrb[3].mxu0 }
 0x1b0   :  { %v229_v20 = vpop.f32.mrb[0].mxu1 }
 0x1b1   :  { %v300_v21 = vadd.f32 %v299_v11, %v229_v20  ;;  %v1375_v22 = vpop.f32.mrb[1].mxu1  ;;  %v591_v11 = vld [vmem:[%s2496_s9 + $0x68] sm:$0xff]  ;;  %v562_v20 = vld [vmem:[%s2495_s8] sm:$0xff] }
 0x1b2   :  { %v1756_v12 = vpack.c.bf16 %v591_v11, %v590_v10 }
 0x1b3   :  { %v309_v25 = vadd.f32 %v1178_v19, %v300_v21  ;;  %v563_v21 = vld [vmem:[%s2495_s8 + $0x8] sm:$0xff] }
 0x1b4   :  { %v1762_v24 = vpack.c.bf16 %v563_v21, %v562_v20  ;;  %v822_v21 = vld [vmem:[%s2500_s13 + $0x50] sm:$0xff] }
 0x1b5   :  { %v310_v26 = vmax.f32 %v309_v25, 0.0  ;;  %v564_v25 = vld [vmem:[%s2495_s8 + $0x10] sm:$0xff] }
 0x1b7   :  { %1412 = vmatpush3.msra.mxu0 %v310_v26  ;;  %1484 = vmatmul.mubr.f32.vlgmr.msra.gmra.mrb[2].mxu1 %v310_v26  ;;  %v565_v26 = vld [vmem:[%s2495_s8 + $0x18] sm:$0xff] }
 0x1b8   :  { %1414 = vmatmul.mubr.msk.f32.vlgmr.msra.gmra.mrb[4].mxu0 %vm89_vm0, %v1964_v1  ;;  %1689 = vmatprep.subr.bf16.mxu0 %v1867_v6 }
 0x1b9   :  { %1691 = vmatpush3.bf16.msra.mxu0 %v1690_v27  ;;  %1448 = vmatprep.mubr.msk.f32.mxu0 %vm1866_vm1, %v1865_v2  ;;  %v1765_v27 = vpack.c.bf16 %v565_v26, %v564_v25  ;;  %v825_v25 = vld [vmem:[%s2500_s13 + $0x68] sm:$0xff] }
 0x1ba   :  { %1692 = vmatprep.subr.bf16.mxu0 %v1867_v6  ;;  %1523 = vmatprep.mubr.msk.f32.mxu1 %vm1866_vm1, %v1865_v2 }
 0x1bb   :  { %1739 = vmatpush3.bf16.msra.mxu1 %v1738_v56  ;;  %v1819_v56 = vpack.c.bf16 %v905_v55, %v904_v54 }
 0x1bc   :  { %1740 = vmatprep.subr.bf16.mxu1 %v1867_v6 }
 0x1bd   :  { %1694 = vmatpush3.bf16.msra.mxu0 %v1693_v30  ;;  %v1768_v30 = vpack.c.bf16 %v567_v29, %v566_v28  ;;  %v826_v29 = vld [vmem:[%s2500_s13 + $0x70] sm:$0xff] }
 0x1be   :  { %1695 = vmatprep.subr.bf16.mxu0 %v1867_v6 }
 0x1bf   :  { %1742 = vmatpush3.bf16.msra.mxu1 %v1741_v58  ;;  %v907_v58 = vld [vmem:[%s2501_s14 + $0x48] sm:$0xff] }
 0x1c0   :  { %1743 = vmatprep.subr.bf16.mxu1 %v1867_v6  ;;  %v1822_v59 = vpack.c.bf16 %v907_v58, %v906_v57 }
 0x1c1   :  { %1697 = vmatpush3.bf16.msra.mxu0 %v1696_v33  ;;  %v570_v33 = vld [vmem:[%s2495_s8 + $0x40] sm:$0xff] }
 0x1c2   :  { %1698 = vmatprep.subr.bf16.mxu0 %v1867_v6  ;;  %v1774_v35 = vpack.c.bf16 %v571_v34, %v570_v33  ;;  %v1182_v33 = vld [vmem:[%s2497_s10] ss:$0 sm:$0xff] }
 0x1c3   :  { %1745 = vmatpush3.bf16.msra.mxu1 %v1744_v61  ;;  %v909_v61 = vld [vmem:[%s2501_s14 + $0x58] sm:$0xff] }
 0x1c4   :  { %1746 = vmatprep.subr.bf16.mxu1 %v1867_v6  ;;  %v1825_v62 = vpack.c.bf16 %v909_v61, %v908_v60 }
 0x1c5   :  { %1700 = vmatpush3.bf16.msra.mxu0 %v1699_v36  ;;  %v572_v36 = vld [vmem:[%s2495_s8 + $0x50] sm:$0xff] }
 0x1c6   :  { %1701 = vmatprep.subr.bf16.mxu0 %v1867_v6  ;;  %v1777_v38 = vpack.c.bf16 %v573_v37, %v572_v36 }
 0x1c7   :  { %1748 = vmatpush3.bf16.msra.mxu1 %v1747_v0  ;;  %v911_v0 = vld [vmem:[%s2501_s14 + $0x68] sm:$0xff] }
 0x1c8   :  { %1749 = vmatprep.subr.bf16.mxu1 %v1867_v6  ;;  %v1828_v3 = vpack.c.bf16 %v911_v0, %v910_v63 }
 0x1c9   :  { %1703 = vmatpush3.bf16.msra.mxu0 %v1702_v39  ;;  %v574_v39 = vld [vmem:[%s2495_s8 + $0x60] sm:$0xff] }
 0x1ca   :  { %1704 = vmatprep.subr.bf16.mxu0 %v1867_v6  ;;  %v1780_v41 = vpack.c.bf16 %v575_v40, %v574_v39 }
 0x1cb   :  { %1751 = vmatpush3.bf16.msra.mxu1 %v1750_v5  ;;  %v813_v5 = vld [vmem:[%s2500_s13 + $0x8] sm:$0xff] }
 0x1cc   :  { %1752 = vmatprep.subr.bf16.mxu1 %v1867_v6  ;;  %v1786_v7 = vpack.c.bf16 %v813_v5, %v812_v4 }
 0x1cd   :  { %1706 = vmatpush3.bf16.msra.mxu0 %v1705_v42  ;;  %v576_v42 = vld [vmem:[%s2495_s8 + $0x70] sm:$0xff] }
 0x1ce   :  { %1707 = vmatprep.subr.bf16.mxu0 %v1867_v6  ;;  %v1783_v44 = vpack.c.bf16 %v577_v43, %v576_v42 }
 0x1cf   :  { %1754 = vmatpush3.bf16.msra.mxu1 %v1753_v9  ;;  %v815_v9 = vld [vmem:[%s2500_s13 + $0x18] sm:$0xff] }
 0x1d0   :  { %1755 = vmatprep.subr.bf16.mxu1 %v1867_v6 }
 0x1d1   :  { %1709 = vmatpush3.bf16.msra.mxu0 %v1708_v45  ;;  %v898_v45 = vld [vmem:[%s2501_s14] sm:$0xff] }
 0x1d2   :  { %1710 = vmatprep.subr.bf16.mxu0 %v1867_v6  ;;  %v1810_v47 = vpack.c.bf16 %v899_v46, %v898_v45  ;;  %v985_v45 = vld [vmem:[%s2498_s11 + $0x8] sm:$0xff]  ;;  %v1187_v46 = vld [vmem:[%s2502_s15] ss:$0 sm:$0xff] }
 0x1d3   :  { %1757 = vmatpush3.bf16.msra.mxu1 %v1756_v12  ;;  %v1789_v12 = vpack.c.bf16 %v815_v9, %v814_v8 }
 0x1d4   :  { %1758 = vmatprep.subr.bf16.mxu1 %v1867_v6 }
 0x1d5   :  { %1712 = vmatpush3.bf16.msra.mxu0 %v1711_v48  ;;  %v900_v48 = vld [vmem:[%s2501_s14 + $0x10] sm:$0xff] }
 0x1d6   :  { %1486 = vmatprep.subr.mxu0 %v1865_v2 }
 0x1d7   :  { %1760 = vmatpush3.bf16.msra.mxu1 %v1759_v15  ;;  %v1792_v15 = vpack.c.bf16 %v817_v14, %v816_v13 }
 0x1d8   :  { %1785 = vmatprep.subr.bf16.mxu1 %v1867_v6 }
 0x28a   :  { %v550_v49 = vpop.f32.mrb[2].mxu1 }
 0x28b   :  { %v410_v50 = vpop.f32.mrb[4].mxu0  ;;  %v1485_v51 = vpop.f32.mrb[3].mxu1 }
 0x28c   :  { %v1415_v52 = vpop.f32.mrb[5].mxu0  ;;  %1449 = vmatmul.mubr.f32.vlgmr.msra.gmra.mrb[6].mxu0 %v410_v50  ;;  %v902_v51 = vld [vmem:[%s2501_s14 + $0x20] sm:$0xff] }
 0x28d   :  { %1488 = vmatprep.mubr.msk.f32.mxu0 %vm1866_vm1, %v1865_v2  ;;  %v903_v52 = vld [vmem:[%s2501_s14 + $0x28] sm:$0xff] }
 0x28e   :  { %v1816_v53 = vpack.c.bf16 %v903_v52, %v902_v51 }
 0x35f   :  { %v480_v17 = vpop.f32.mrb[6].mxu0 }
 0x360   :  { %v551_v18 = vadd.f32 %v550_v49, %v480_v17  ;;  %v1450_v19 = vpop.f32.mrb[7].mxu0  ;;  %v901_v49 = vld [vmem:[%s2501_s14 + $0x18] sm:$0xff] }
 0x361   :  { %v1813_v50 = vpack.c.bf16 %v901_v49, %v900_v48  ;;  %v821_v19 = vld [vmem:[%s2500_s13 + $0x48] sm:$0xff] }
 0x362   :  { %v560_v22 = vadd.f32 %v1180_v16, %v551_v18  ;;  %v818_v16 = vld [vmem:[%s2500_s13 + $0x30] sm:$0xff]  ;;  %v820_v18 = vld [vmem:[%s2500_s13 + $0x40] sm:$0xff] }
 0x363   :  { %v1798_v20 = vpack.c.bf16 %v821_v19, %v820_v18 }
 0x364   :  { %v561_v23 = vmax.f32 %v560_v22, 0.0  ;;  %v823_v22 = vld [vmem:[%s2500_s13 + $0x58] sm:$0xff] }
 0x366   :  { %1487 = vmatpush3.msra.mxu0 %v561_v23 }
 0x367   :  { %1489 = vmatmul.mubr.msk.f32.vlgmr.msra.gmra.mrb[8].mxu0 %vm89_vm0, %v1964_v1  ;;  %1761 = vmatprep.subr.bf16.mxu0 %v1867_v6  ;;  %v568_v1 = vld [vmem:[%s2495_s8 + $0x30] sm:$0xff] }
 0x368   :  { %1763 = vmatpush3.bf16.msra.mxu0 %v1762_v24  ;;  %1558 = vmatprep.mubr.msk.f32.mxu0 %vm1866_vm1, %v1865_v2  ;;  %v1771_v32 = vpack.c.bf16 %v569_v31, %v568_v1  ;;  %v824_v24 = vld [vmem:[%s2500_s13 + $0x60] sm:$0xff]  ;;  %v912_v1 = vld [vmem:[%s2501_s14 + $0x70] sm:$0xff] }
 0x369   :  { %1764 = vmatprep.subr.bf16.mxu0 %v1867_v6  ;;  %v1804_v26 = vpack.c.bf16 %v825_v25, %v824_v24 }
 0x36c   :  { %1766 = vmatpush3.bf16.msra.mxu0 %v1765_v27 }
 0x36d   :  { %1767 = vmatprep.subr.bf16.mxu0 %v1867_v6 }
 0x370   :  { %1769 = vmatpush3.bf16.msra.mxu0 %v1768_v30  ;;  %v827_v30 = vld [vmem:[%s2500_s13 + $0x78] sm:$0xff] }
 0x371   :  { %1770 = vmatprep.subr.bf16.mxu0 %v1867_v6  ;;  %v1807_v31 = vpack.c.bf16 %v827_v30, %v826_v29 }
 0x374   :  { %1772 = vmatpush3.bf16.msra.mxu0 %v1771_v32  ;;  %v913_v32 = vld [vmem:[%s2501_s14 + $0x78] sm:$0xff] }
 0x375   :  { %1773 = vmatprep.subr.bf16.mxu0 %v1867_v6 }
 0x378   :  { %1775 = vmatpush3.bf16.msra.mxu0 %v1774_v35 }
 0x379   :  { %1776 = vmatprep.subr.bf16.mxu0 %v1867_v6 }
 0x37c   :  { %1778 = vmatpush3.bf16.msra.mxu0 %v1777_v38  ;;  %v986_v38 = vld [vmem:[%s2499_s12] sm:$0xff] }
 0x37d   :  { %1779 = vmatprep.subr.bf16.mxu0 %v1867_v6 }
 0x380   :  { %1781 = vmatpush3.bf16.msra.mxu0 %v1780_v41  ;;  %v987_v41 = vld [vmem:[%s2499_s12 + $0x8] sm:$0xff] }
 0x381   :  { %1782 = vmatprep.subr.bf16.mxu0 %v1867_v6 }
 0x384   :  { %1784 = vmatpush3.bf16.msra.mxu0 %v1783_v44  ;;  %v984_v44 = vld [vmem:[%s2498_s11] sm:$0xff] }
 0x385   :  { %1809 = vmatprep.subr.bf16.mxu0 %v1867_v6 }
 0x387   :  { %1559 = vmatmul.mubr.f32.vlgmr.msra.gmra.mrb[10].mxu0 %v561_v23  ;;  %v1801_v23 = vpack.c.bf16 %v823_v22, %v822_v21 }
 0x388   :  { %1628 = vmatprep.mubr.msk.f32.mxu0 %vm1866_vm1, %v1865_v2  ;;  %1811 = vmatpush3.bf16.msra.mxu0 %v1810_v47 }
 0x389   :  { %1812 = vmatprep.subr.bf16.mxu0 %v1867_v6 }
 0x38c   :  { %1814 = vmatpush3.bf16.msra.mxu0 %v1813_v50 }
 0x38d   :  { %1815 = vmatprep.subr.bf16.mxu0 %v1867_v6 }
 0x390   :  { %1817 = vmatpush3.bf16.msra.mxu0 %v1816_v53 }
 0x391   :  { %1818 = vmatprep.subr.bf16.mxu0 %v1867_v6 }
 0x394   :  { %1820 = vmatpush3.bf16.msra.mxu0 %v1819_v56 }
 0x395   :  { %1821 = vmatprep.subr.bf16.mxu0 %v1867_v6 }
 0x398   :  { %1823 = vmatpush3.bf16.msra.mxu0 %v1822_v59 }
 0x399   :  { %1824 = vmatprep.subr.bf16.mxu0 %v1867_v6 }
 0x39c   :  { %1826 = vmatpush3.bf16.msra.mxu0 %v1825_v62 }
 0x39d   :  { %1827 = vmatprep.subr.bf16.mxu0 %v1867_v6 }
 0x3a0   :  { %1829 = vmatpush3.bf16.msra.mxu0 %v1828_v3 }
 0x3a1   :  { %1830 = vmatprep.subr.bf16.mxu0 %v1867_v6 }
 0x43a   :  { %v661_v10 = vpop.f32.mrb[8].mxu0 }
 0x43b   :  { %v1490_v11 = vpop.f32.mrb[9].mxu0  ;;  %1524 = vmatmul.mubr.f32.vlgmr.msra.gmra.mrb[4].mxu1 %v661_v10 }
 0x43c   :  { %1787 = vmatpush3.bf16.msra.mxu1 %v1786_v7  ;;  %1593 = vmatprep.mubr.msk.f32.mxu1 %vm1866_vm1, %v1865_v2  ;;  %v819_v2 = vld [vmem:[%s2500_s13 + $0x38] sm:$0xff] }
 0x43d   :  { %1788 = vmatprep.subr.bf16.mxu1 %v1867_v6  ;;  %v1795_v17 = vpack.c.bf16 %v819_v2, %v818_v16 }
 0x440   :  { %1790 = vmatpush3.bf16.msra.mxu1 %v1789_v12 }
 0x441   :  { %1791 = vmatprep.subr.bf16.mxu1 %v1867_v6 }
 0x444   :  { %1793 = vmatpush3.bf16.msra.mxu1 %v1792_v15 }
 0x445   :  { %1794 = vmatprep.subr.bf16.mxu1 %v1867_v6 }
 0x448   :  { %1796 = vmatpush3.bf16.msra.mxu1 %v1795_v17 }
 0x449   :  { %1797 = vmatprep.subr.bf16.mxu1 %v1867_v6 }
 0x44c   :  { %1799 = vmatpush3.bf16.msra.mxu1 %v1798_v20 }
 0x44d   :  { %1800 = vmatprep.subr.bf16.mxu1 %v1867_v6 }
 0x450   :  { %1802 = vmatpush3.bf16.msra.mxu1 %v1801_v23 }
 0x451   :  { %1803 = vmatprep.subr.bf16.mxu1 %v1867_v6 }
 0x454   :  { %1805 = vmatpush3.bf16.msra.mxu1 %v1804_v26 }
 0x455   :  { %1806 = vmatprep.subr.bf16.mxu1 %v1867_v6  ;;  %v1831_v6 = vpack.c.bf16 %v913_v32, %v912_v1 }
 0x457   :  { %1832 = vmatpush3.bf16.msra.mxu0 %v1831_v6 }
 0x458   :  { %1808 = vmatpush3.bf16.msra.mxu1 %v1807_v31 }
 0x45a   :  { %v801_v27 = vpop.f32.mrb[10].mxu0 }
 0x45b   :  { %v1560_v28 = vpop.f32.mrb[11].mxu0 }
 0x50e   :  { %v731_v34 = vpop.f32.mrb[4].mxu1 }
 0x50f   :  { %v802_v35 = vadd.f32 %v801_v27, %v731_v34  ;;  %v1525_v36 = vpop.f32.mrb[5].mxu1 }
 0x511   :  { %v811_v37 = vadd.f32 %v1182_v33, %v802_v35 }
 0x513   :  { %1594 = vmatmul.mubr.f32.vlgmr.msra.gmra.mrb[6].mxu1 %v811_v37  ;;  %1629 = vmatmul.mubr.f32.vlgmr.msra.gmra.mrb[12].mxu0 %v811_v37 }
 0x514   :  { %1633 = vmatprep.mubr.msk.f32.mxu1 %vm89_vm0, %v986_v38 }
 0x5e6   :  { %v894_v39 = vpop.f32.mrb[6].mxu1  ;;  %v980_v40 = vpop.f32.mrb[12].mxu0 }
 0x5e7   :  { %v1595_v42 = vpop.f32.mrb[7].mxu1  ;;  %v1630_v43 = vpop.f32.mrb[13].mxu0  ;;  %1631 = vmatprep.subr.mxu1 %v980_v40 }
 0x5e8   :  { %1632 = vmatpush3.msra.mxu1 %v980_v40 }
 0x5e9   :  { %1634 = vmatmul.mubr.msk.f32.vlgmr.msra.gmra.mrb[8].mxu1 %vm89_vm0, %v987_v41  ;;  %1636 = vmatprep.subr.mxu1 %v894_v39 }
 0x5ea   :  { %1637 = vmatpush3.msra.mxu1 %v894_v39  ;;  %1638 = vmatprep.mubr.msk.f32.mxu1 %vm89_vm0, %v984_v44 }
 0x5f1   :  { %1639 = vmatmul.mubr.msk.f32.vlgmr.msra.gmra.mrb[8].mxu1 %vm89_vm0, %v985_v45 }
 0x6c4   :  { %v1640_v47 = vpop.f32.mrb[8].mxu1 }
 0x6c5   :  { %v1158_v48 = vadd.f32 %v1640_v47, %v1187_v46  ;;  %v1141_v49 = vpop.f32.mrb[9].mxu1 }
 0x6c6   :  { %v1157_v50 = vadd.f32 %v1187_v46, %v1141_v49 }
 0x6c7   :  { %1160 = vst [vmem:[#allocation2 + $0x8] sm:$0xff] %v1158_v48 }
 0x6c8   :  { %1159 = vst [vmem:[#allocation2] sm:$0xff] %v1157_v50 }
 0x6c9   :  { %1852 = shalt.err (!%p1849_p4)
}
 0x6ca   :  { %s1853_s15 = scalar_lea.hbm %s2503_s16, 256 }
 0x6cb   :  { %p1854_p5 = scmp.ne.s32.totalorder %s2503_s16, %s1853_s15  ;;  %p1857_p6 = scmp.lt.u32.totalorder %s1853_s15, %s2503_s16 }
 0x6cd   :  { %p1859_p7 = pnand %p1857_p6, %p1854_p5 }
 0x6cf   :  { %1862 = shalt.err (!%p1859_p7)
}
 0x6d0   :  { %s1869_s21 = smov 128   ;;  %s1870_s22 = smov 8  }
 0x6d1   :  { %1172 = dma.vmem_to_hbm [thread:$0]  %s1167_s0, 256, %s2503_s16, [#allocation3], %s1869_s21, %s1869_s21, %s1870_s22  }
 0x6d2   :  { %1863 = dma.done.wait [#allocation3], 256  }
 0x6d3   :  { %1864 = vsyncadd [#allocation3], 4294967040 }
 0x6d4   :  { %1176 = vsyncpa [#allocation3], 1 }

</bundles_post_ra>
